<compile_context>
chip_gen: v7x
topology: tpu7x:2x2x1
jax: 0.10.0
libtpu: 0.0.40
codegen_flags: <defaults>
</compile_context>

<pallas_src>
import jax
import jax.numpy as jnp
from jax.experimental import pallas as pl
from jax.experimental.pallas import tpu as pltpu


def _ceil_to(x, m):
    return ((x + m - 1) // m) * m


def _vmem_capacity_bytes():
    """Per-core VMEM capacity; conservative (v7x = 64 MiB/TC) fallback."""
    try:
        info = pltpu.get_tpu_info()
        cap = getattr(info, "vmem_capacity_bytes", None)
        if cap:
            return int(cap)
    except Exception:
        pass
    return 64 << 20


def _vmem_estimate_bytes(tile_n, c_dim, latent, compute_dtype):
    """Rough per-step VMEM footprint (double-buffered I/O tiles + weights + live values)."""
    f32 = 4
    cw = jnp.dtype(compute_dtype).itemsize
    io = 2 * tile_n * (c_dim + 2 * latent) * f32                     # content+emb in, out (x2 buffers)
    weights = 2 * ((c_dim + latent) * latent + 2 * latent * latent) * cw + 2 * 3 * latent * f32
    act = tile_n * (c_dim + 3 * latent) * cw + 2 * tile_n * latent * f32  # bf16 casts + h1/h2 f32
    return io + weights + act


def _lara_generator_kernel(c_ref, e_ref, w1c_ref, w1e_ref, w2_ref, w3_ref, b_ref, o_ref):
    """3-layer MLP on one row tile: fused concat-matmul + bias + tanh.

    Matmul operands are cast to the weights' dtype (bf16 by default) for MXU
    throughput; accumulation / bias / tanh stay in f32.
    """
    cdt = w1c_ref.dtype
    c = c_ref[...].astype(cdt)
    e = e_ref[...].astype(cdt)
    h1 = jnp.tanh(
        jnp.dot(c, w1c_ref[...], preferred_element_type=jnp.float32)
        + jnp.dot(e, w1e_ref[...], preferred_element_type=jnp.float32)
        + b_ref[0:1, :]
    )
    h2 = jnp.tanh(
        jnp.dot(h1.astype(cdt), w2_ref[...], preferred_element_type=jnp.float32)
        + b_ref[1:2, :]
    )
    h3 = jnp.tanh(
        jnp.dot(h2.astype(cdt), w3_ref[...], preferred_element_type=jnp.float32)
        + b_ref[2:3, :]
    )
    o_ref[...] = h3.astype(o_ref.dtype)


def lara_generator_forward(item_content, item_emb, params, *,
                           tile_n=4096,
                           compute_dtype=jnp.bfloat16,
                           out_dtype=jnp.float32):
    """Pallas implementation of the G_Linear1/2/3 + tanh stack.

    item_content: [N, content_dim] float32
    item_emb    : [N, latent]      float32
    params      : w1 (C+L, L), b1 (L,), w2 (L, L), b2 (L,), w3 (L, L), b3 (L,)
    returns     : fake_emb [N, latent] out_dtype
    """
    n, c_dim = item_content.shape
    latent = params["w1"].shape[1]
    assert item_emb.shape == (n, latent)
    assert params["w1"].shape[0] == c_dim + latent

    # Split W1 at trace time so the kernel never materializes the concat.
    w1 = params["w1"]
    w1c = w1[:c_dim].astype(compute_dtype)    # (C, L)
    w1e = w1[c_dim:].astype(compute_dtype)    # (L, L)
    w2 = params["w2"].astype(compute_dtype)   # (L, L)
    w3 = params["w3"].astype(compute_dtype)   # (L, L)
    bias = jnp.stack([params["b1"], params["b2"], params["b3"]], axis=0).astype(jnp.float32)  # (3, L)

    # ---- generation-aware VMEM budget -------------------------------------
    vmem_cap = _vmem_capacity_bytes()
    vmem_budget = max(vmem_cap - (24 << 20), vmem_cap // 2)   # ~40 MiB on v7x, ~104 MiB on v5e/v6e

    # ---- choose the row tile: big, multiple of 8, >= 2 grid steps for v7x --
    tile_n = int(tile_n)
    tile_n = max(8, min(tile_n, _ceil_to(n, 8)))
    if n > 8:
        # Keep at least 2 grid steps so the "parallel" axis can shard across
        # v7x's two TensorCores; costs ~0.35 us on single-TC chips.
        tile_n = min(tile_n, _ceil_to((n + 1) // 2, 8))
    tile_n = _ceil_to(tile_n, 8)
    while tile_n > 256 and _vmem_estimate_bytes(tile_n, c_dim, latent, compute_dtype) > vmem_budget:
        tile_n = _ceil_to(max(tile_n // 2, 8), 8)
    est = _vmem_estimate_bytes(tile_n, c_dim, latent, compute_dtype)
    vmem_limit = int(min(vmem_cap * 7 // 8, max(4 * est, 32 << 20)))

    # ---- pad rows to a tile multiple (tail rows dropped afterwards) --------
    n_pad = _ceil_to(n, tile_n)
    if n_pad != n:
        item_content = jnp.pad(item_content, ((0, n_pad - n), (0, 0)))
        item_emb = jnp.pad(item_emb, ((0, n_pad - n), (0, 0)))

    grid = (n_pad // tile_n,)
    fake = pl.pallas_call(
        _lara_generator_kernel,
        # Output last dim is the true `latent` (block == full array dim, legal
        # BlockSpec) -> no lane padding, no trailing lane-slice pass.
        out_shape=jax.ShapeDtypeStruct((n_pad, latent), out_dtype),
        grid_spec=pltpu.PrefetchScalarGridSpec(
            num_scalar_prefetch=0,
            grid=grid,
            in_specs=[
                pl.BlockSpec((tile_n, c_dim), lambda i: (i, 0)),    # content row tile
                pl.BlockSpec((tile_n, latent), lambda i: (i, 0)),   # emb row tile
                pl.BlockSpec((c_dim, latent), lambda i: (0, 0)),    # W1 (content half), grid-invariant
                pl.BlockSpec((latent, latent), lambda i: (0, 0)),   # W1 (emb half)
                pl.BlockSpec((latent, latent), lambda i: (0, 0)),   # W2
                pl.BlockSpec((latent, latent), lambda i: (0, 0)),   # W3
                pl.BlockSpec((3, latent), lambda i: (0, 0)),        # fused biases
            ],
            out_specs=pl.BlockSpec((tile_n, latent), lambda i: (i, 0)),
        ),
        compiler_params=pltpu.CompilerParams(
            dimension_semantics=("parallel",),
            vmem_limit_bytes=vmem_limit,
        ),
    )(item_content, item_emb, w1c, w1e, w2, w3, bias)

    # Only a cheap prefix row-slice, and only when N was not a tile multiple.
    return fake if n_pad == n else fake[:n]


def lara_forward(item_content, item_emb, user_emb, params):
    """Full LARA_Learner.forward() for cold_object == 'item': (user_emb, fake_emb)."""
    fake_emb = lara_generator_forward(item_content, item_emb, params)
    return user_emb, fake_emb


def _init_params(key, content_dim, latent):
    """Deterministic synthetic initialization matching the module __init__ shapes.
    # TODO(synk): the real module loads pretrained user/item embeddings via torch.load;
    # synthetic random embeddings/weights are used here instead."""
    ks = jax.random.split(key, 6)
    scale1 = 1.0 / jnp.sqrt(content_dim + latent)
    scale2 = 1.0 / jnp.sqrt(latent)
    return {
        "w1": jax.random.uniform(ks[0], (content_dim + latent, latent),
                                 jnp.float32, -scale1, scale1),
        "b1": jax.random.uniform(ks[1], (latent,), jnp.float32, -scale1, scale1),
        "w2": jax.random.uniform(ks[2], (latent, latent),
                                 jnp.float32, -scale2, scale2),
        "b2": jax.random.uniform(ks[3], (latent,), jnp.float32, -scale2, scale2),
        "w3": jax.random.uniform(ks[4], (latent, latent),
                                 jnp.float32, -scale2, scale2),
        "b3": jax.random.uniform(ks[5], (latent,), jnp.float32, -scale2, scale2),
    }


def _reference_forward_f32(item_content, item_emb, user_emb, params):
    """Pure f32 reference (exactly the PyTorch math)."""
    x = jnp.concatenate([item_content, item_emb], axis=-1)
    h1 = jnp.tanh(x @ params["w1"] + params["b1"])
    h2 = jnp.tanh(h1 @ params["w2"] + params["b2"])
    fake = jnp.tanh(h2 @ params["w3"] + params["b3"])
    return user_emb, fake


def _reference_forward_matched(item_content, item_emb, params, compute_dtype):
    """Reference with the same bf16-operand / f32-accumulate policy as the kernel."""
    c_dim = item_content.shape[1]
    w1c = params["w1"][:c_dim].astype(compute_dtype)
    w1e = params["w1"][c_dim:].astype(compute_dtype)
    h1 = jnp.tanh(
        jnp.dot(item_content.astype(compute_dtype), w1c, preferred_element_type=jnp.float32)
        + jnp.dot(item_emb.astype(compute_dtype), w1e, preferred_element_type=jnp.float32)
        + params["b1"])
    h2 = jnp.tanh(
        jnp.dot(h1.astype(compute_dtype), params["w2"].astype(compute_dtype),
                preferred_element_type=jnp.float32) + params["b2"])
    return jnp.tanh(
        jnp.dot(h2.astype(compute_dtype), params["w3"].astype(compute_dtype),
                preferred_element_type=jnp.float32) + params["b3"])


if __name__ == "__main__":
    # Small, deterministic shapes consistent with the module's forward().
    # N_ITEMS deliberately not a multiple of 8 to exercise the row-padding path.
    N_ITEMS, N_USERS = 20, 8
    CONTENT_DIM, LATENT = 32, 32

    key = jax.random.PRNGKey(0)
    k_content, k_item, k_user, k_params = jax.random.split(key, 4)

    item_content = jax.random.normal(k_content, (N_ITEMS, CONTENT_DIM), jnp.float32)
    item_emb = jax.random.normal(k_item, (N_ITEMS, LATENT), jnp.float32)
    user_emb = jax.random.normal(k_user, (N_USERS, LATENT), jnp.float32)
    params = _init_params(k_params, CONTENT_DIM, LATENT)

    user_out, fake_emb = lara_forward(item_content, item_emb, user_emb, params)
    jax.block_until_ready((user_out, fake_emb))

    # Correctness: exact vs a matched-precision reference, loose vs pure-f32 math.
    ref_user, ref_fake_f32 = _reference_forward_f32(item_content, item_emb, user_emb, params)
    ref_fake_matched = _reference_forward_matched(item_content, item_emb, params, jnp.bfloat16)

    assert user_out.shape == (N_USERS, LATENT)
    assert fake_emb.shape == (N_ITEMS, LATENT)
    assert fake_emb.dtype == jnp.float32
    assert jnp.allclose(user_out, ref_user)
    assert jnp.allclose(fake_emb, ref_fake_matched, atol=5e-3, rtol=0.0)
    assert jnp.allclose(fake_emb, ref_fake_f32, atol=5e-2, rtol=0.0)

    print("KERNEL_OK")
</pallas_src>

<mosaic_0001>
module attributes {stable_mosaic.version = 11 : i64} {
  func.func @_lara_generator_kernel(%arg0: i32, %arg1: memref<16x32xf32, #tpu.memory_space<vmem>>, %arg2: memref<16x32xf32, #tpu.memory_space<vmem>>, %arg3: memref<32x32xbf16, #tpu.memory_space<vmem>>, %arg4: memref<32x32xbf16, #tpu.memory_space<vmem>>, %arg5: memref<32x32xbf16, #tpu.memory_space<vmem>>, %arg6: memref<32x32xbf16, #tpu.memory_space<vmem>>, %arg7: memref<3x32xf32, #tpu.memory_space<vmem>>, %arg8: memref<16x32xf32, #tpu.memory_space<vmem>>) attributes {dimension_semantics = [#tpu.dimension_semantics<parallel>], iteration_bounds = array<i64: 2>, scalar_prefetch = 0 : i64, scratch_operands = 0 : i64, tpu.core_type = #tpu.core_type<tc>, window_params = [{transform_indices = @transform_0, window_bounds = array<i64: 16, 32>}, {transform_indices = @transform_1, window_bounds = array<i64: 16, 32>}, {pipeline_mode = #tpu.pipeline_mode<synchronous>, transform_indices = @transform_2, window_bounds = array<i64: 32, 32>}, {pipeline_mode = #tpu.pipeline_mode<synchronous>, transform_indices = @transform_3, window_bounds = array<i64: 32, 32>}, {pipeline_mode = #tpu.pipeline_mode<synchronous>, transform_indices = @transform_4, window_bounds = array<i64: 32, 32>}, {pipeline_mode = #tpu.pipeline_mode<synchronous>, transform_indices = @transform_5, window_bounds = array<i64: 32, 32>}, {pipeline_mode = #tpu.pipeline_mode<synchronous>, transform_indices = @transform_6, window_bounds = array<i64: 3, 32>}, {transform_indices = @transform_7, window_bounds = array<i64: 16, 32>}]} {
    %c0 = arith.constant 0 : index
    %c0_0 = arith.constant 0 : index
    %0 = vector.load %arg1[%c0, %c0_0] : memref<16x32xf32, #tpu.memory_space<vmem>>, vector<16x32xf32>
    %1 = arith.truncf %0 : vector<16x32xf32> to vector<16x32xbf16>
    %c0_1 = arith.constant 0 : index
    %c0_2 = arith.constant 0 : index
    %2 = vector.load %arg2[%c0_1, %c0_2] : memref<16x32xf32, #tpu.memory_space<vmem>>, vector<16x32xf32>
    %3 = arith.truncf %2 : vector<16x32xf32> to vector<16x32xbf16>
    %c0_3 = arith.constant 0 : index
    %c0_4 = arith.constant 0 : index
    %4 = vector.load %arg3[%c0_3, %c0_4] : memref<32x32xbf16, #tpu.memory_space<vmem>>, vector<32x32xbf16>
    %cst = arith.constant dense<0.000000e+00> : vector<16x32xf32>
    %5 = tpu.matmul %1, %4, %cst {dimension_numbers = #tpu.dot_dimension_numbers<[1], [0], [0], [1], [0, 0, 1, 1], [], []>} : vector<16x32xbf16>, vector<32x32xbf16>, vector<16x32xf32> -> vector<16x32xf32>
    %c0_5 = arith.constant 0 : index
    %c0_6 = arith.constant 0 : index
    %6 = vector.load %arg4[%c0_5, %c0_6] : memref<32x32xbf16, #tpu.memory_space<vmem>>, vector<32x32xbf16>
    %cst_7 = arith.constant dense<0.000000e+00> : vector<16x32xf32>
    %7 = tpu.matmul %3, %6, %cst_7 {dimension_numbers = #tpu.dot_dimension_numbers<[1], [0], [0], [1], [0, 0, 1, 1], [], []>} : vector<16x32xbf16>, vector<32x32xbf16>, vector<16x32xf32> -> vector<16x32xf32>
    %8 = arith.addf %5, %7 : vector<16x32xf32>
    %c0_8 = arith.constant 0 : index
    %c0_9 = arith.constant 0 : index
    %9 = vector.load %arg7[%c0_8, %c0_9] : memref<3x32xf32, #tpu.memory_space<vmem>>, vector<1x32xf32>
    %10 = vector.broadcast %9 : vector<1x32xf32> to vector<16x32xf32>
    %11 = arith.addf %8, %10 : vector<16x32xf32>
    %12 = math.tanh %11 : vector<16x32xf32>
    %13 = arith.truncf %12 : vector<16x32xf32> to vector<16x32xbf16>
    %c0_10 = arith.constant 0 : index
    %c0_11 = arith.constant 0 : index
    %14 = vector.load %arg5[%c0_10, %c0_11] : memref<32x32xbf16, #tpu.memory_space<vmem>>, vector<32x32xbf16>
    %cst_12 = arith.constant dense<0.000000e+00> : vector<16x32xf32>
    %15 = tpu.matmul %13, %14, %cst_12 {dimension_numbers = #tpu.dot_dimension_numbers<[1], [0], [0], [1], [0, 0, 1, 1], [], []>} : vector<16x32xbf16>, vector<32x32xbf16>, vector<16x32xf32> -> vector<16x32xf32>
    %c1 = arith.constant 1 : index
    %c0_13 = arith.constant 0 : index
    %16 = vector.load %arg7[%c1, %c0_13] : memref<3x32xf32, #tpu.memory_space<vmem>>, vector<1x32xf32>
    %17 = vector.broadcast %16 : vector<1x32xf32> to vector<16x32xf32>
    %18 = arith.addf %15, %17 : vector<16x32xf32>
    %19 = math.tanh %18 : vector<16x32xf32>
    %20 = arith.truncf %19 : vector<16x32xf32> to vector<16x32xbf16>
    %c0_14 = arith.constant 0 : index
    %c0_15 = arith.constant 0 : index
    %21 = vector.load %arg6[%c0_14, %c0_15] : memref<32x32xbf16, #tpu.memory_space<vmem>>, vector<32x32xbf16>
    %cst_16 = arith.constant dense<0.000000e+00> : vector<16x32xf32>
    %22 = tpu.matmul %20, %21, %cst_16 {dimension_numbers = #tpu.dot_dimension_numbers<[1], [0], [0], [1], [0, 0, 1, 1], [], []>} : vector<16x32xbf16>, vector<32x32xbf16>, vector<16x32xf32> -> vector<16x32xf32>
    %c2 = arith.constant 2 : index
    %c0_17 = arith.constant 0 : index
    %23 = vector.load %arg7[%c2, %c0_17] : memref<3x32xf32, #tpu.memory_space<vmem>>, vector<1x32xf32>
    %24 = vector.broadcast %23 : vector<1x32xf32> to vector<16x32xf32>
    %25 = arith.addf %22, %24 : vector<16x32xf32>
    %26 = math.tanh %25 : vector<16x32xf32>
    %c0_18 = arith.constant 0 : index
    %c0_19 = arith.constant 0 : index
    %27 = vector.load %arg8[%c0_18, %c0_19] : memref<16x32xf32, #tpu.memory_space<vmem>>, vector<16x32xf32>
    tpu.vector_store %arg8[%c0_18, %c0_19], %26 {strides = array<i32>} : memref<16x32xf32, #tpu.memory_space<vmem>>, vector<16x32xf32>,
    return
  }
  func.func @transform_0(%arg0: i32) -> (i32, i32) {
    %c0_i32 = arith.constant 0 : i32
    %c0_i32_0 = arith.constant 0 : i32
    return %arg0, %c0_i32 : i32, i32
  }
  func.func @transform_1(%arg0: i32) -> (i32, i32) {
    %c0_i32 = arith.constant 0 : i32
    %c0_i32_0 = arith.constant 0 : i32
    return %arg0, %c0_i32 : i32, i32
  }
  func.func @transform_2(%arg0: i32) -> (i32, i32) {
    %c0_i32 = arith.constant 0 : i32
    %c0_i32_0 = arith.constant 0 : i32
    %c0_i32_1 = arith.constant 0 : i32
    return %c0_i32, %c0_i32_0 : i32, i32
  }
  func.func @transform_3(%arg0: i32) -> (i32, i32) {
    %c0_i32 = arith.constant 0 : i32
    %c0_i32_0 = arith.constant 0 : i32
    %c0_i32_1 = arith.constant 0 : i32
    return %c0_i32, %c0_i32_0 : i32, i32
  }
  func.func @transform_4(%arg0: i32) -> (i32, i32) {
    %c0_i32 = arith.constant 0 : i32
    %c0_i32_0 = arith.constant 0 : i32
    %c0_i32_1 = arith.constant 0 : i32
    return %c0_i32, %c0_i32_0 : i32, i32
  }
  func.func @transform_5(%arg0: i32) -> (i32, i32) {
    %c0_i32 = arith.constant 0 : i32
    %c0_i32_0 = arith.constant 0 : i32
    %c0_i32_1 = arith.constant 0 : i32
    return %c0_i32, %c0_i32_0 : i32, i32
  }
  func.func @transform_6(%arg0: i32) -> (i32, i32) {
    %c0_i32 = arith.constant 0 : i32
    %c0_i32_0 = arith.constant 0 : i32
    %c0_i32_1 = arith.constant 0 : i32
    return %c0_i32, %c0_i32_0 : i32, i32
  }
  func.func @transform_7(%arg0: i32) -> (i32, i32) {
    %c0_i32 = arith.constant 0 : i32
    %c0_i32_0 = arith.constant 0 : i32
    return %arg0, %c0_i32 : i32, i32
  }
}

</mosaic_0001>

<bundles_post_ra>
// kernel: tpu_custom_call.1
= control target key start
LH: loop header
LB: loop body
LE: loop exit
PB: predicated region body
PF: predicated region fallthrough
CT: control target
= control target key end

     0   :  { %s1625_s0 = inlined_call_operand.hbm [shape: f32[32,32], index: 0, kind: input, shape index: {}]   ;;  %s1626_s1 = inlined_call_operand.hbm [shape: f32[32,32], index: 1, kind: input, shape index: {}]   ;;  %s1627_s2 = inlined_call_operand.hbm [shape: bf16[32,32], index: 2, kind: input, shape index: {}]   ;;  %s1628_s3 = inlined_call_operand.hbm [shape: bf16[32,32], index: 3, kind: input, shape index: {}]   ;;  %s1629_s4 = inlined_call_operand.hbm [shape: bf16[32,32], index: 4, kind: input, shape index: {}]   ;;  %s1630_s5 = inlined_call_operand.vmem [shape: bf16[32,32], index: 5, kind: input, shape index: {}]   ;;  %s1631_s6 = inlined_call_operand.vmem [shape: f32[3,32], index: 6, kind: input, shape index: {}]   ;;  %s1632_s7 = inlined_call_operand.hbm [shape: f32[32,32], index: 7, kind: output, shape index: {}]  }
   0x1   :  { %1637 = sst [smem:[#allocation18_spill]] %s1625_s0 }
   0x2   :  { %1638 = sst [smem:[#allocation19_spill]] %s1627_s2 }
   0x3   :  { %1639 = sst [smem:[#allocation20_spill]] %s1628_s3 }
   0x4   :  { %12 = vsyncpa [#allocation3], 0 }
   0x5   :  { %14 = vsyncpa [#allocation3 + $0x1], 0 }
   0x6   :  { %15 = vsyncpa [#allocation6], 0 }
   0x7   :  { %17 = vsyncpa [#allocation6 + $0x1], 0 }
   0x8   :  { %18 = vsyncpa [#allocation9], 0 }
   0x9   :  { %19 = vsyncpa [#allocation4], 0 }
   0xa   :  { %21 = vsyncpa [#allocation4 + $0x1], 0  ;;  %s1270_s24 = smov 0   ;;  %s1272_s25 = smov 0  }
   0xb   :  { %s1274_s26 = smov 0   ;;  %s1276_s27 = smov 0  }
   0xc LB: > { %s1291_s28 = sadd.s32 4294967295, %s1214_s27   ;;  %s796_s29 = sadd.s32 4294967294, %s1214_s27   ;;  %s1214_s27 = sphi %s1276_s27, %s1664_s27   ;;  %s1210_s26 = sphi %s1274_s26, %s1663_s26   ;;  %s1206_s25 = sphi %s1272_s25, %s1662_s25   ;;  %s1202_s24 = sphi %s1270_s24, %s1661_s24  }
   0xd   : > { %p47_p0 = scmp.ne.s32.totalorder %s1206_s25, %s1202_s24  ;;  %p1633_p1 = scmp.eq.s32.totalorder %s1291_s28, 0 }
   0xe   : > { %p208_p3 = scmp.eq.s32.totalorder %s796_s29, 1  ;;  %p797_p5 = scmp.ge.s32.totalorder %s1214_s27, 1 }
   0xf   : > { %p1300_p4 = por %p1633_p1, %p47_p0  ;;  %p215_p7 = scmp.lt.s32.totalorder %s1214_s27, 3 }
  0x10   : > { %p1305_p6 = por %p208_p3, %p47_p0  ;;  %s1216_s10 = smov [#allocation7]  }
  0x11   : > { %s1640_s30 = scalar_select %p1300_p4, 1, 0 }
  0x12   : > { %s1641_s8 = scalar_select %p1305_p6, 1, 0 }
  0x13   : > { %p1310_p8 = pnand %p797_p5, %p215_p7  ;;  %s227_s11 = sshll.u32 %s1216_s10, 4  ;;  %s1314_s11 = int_to_ptr.vmem [resolvable:$true] %s227_s11 }
  0x14   : > { %1642 = sst [smem:[#allocation17_spill]] %s1641_s8  ;;  %s1217_s13 = smov [#allocation8]  }
  0x15   : > { %s1643_s9 = scalar_select %p1310_p8, 1, 0 }
  0x16   : > { %p900_p9 = pneg %p1310_p8  ;;  %s240_s14 = sshll.u32 %s1217_s13, 4  ;;  %s1325_s14 = int_to_ptr.vmem [resolvable:$true] %s240_s14 }
  0x17   : > { %s1218_s15 = smov [#allocation10]   ;;  %s1645_s2 = sld [smem:[#allocation19_spill]] }
  0x18   : > { %p1321_p11 = pnand %p900_p9, %p1633_p1  ;;  %s1327_s16 = sshll.u32 %s1218_s15, 4  ;;  %s254_s16 = int_to_ptr.vmem [resolvable:$true] %s1327_s16 }
  0x1a   : > { %p1337_p13 = pneg %p1321_p11 }
  0x1d   : > { %s992_s19 = scalar_lea.hbm %s1645_s2, 256 }
  0x1e   : > { %p993_p12 = scmp.ne.s32.totalorder %s1645_s2, %s992_s19  ;;  %p999_p5 = scmp.lt.u32.totalorder %s992_s19, %s1645_s2 }
  0x20   : > { %p995_p0 = pnand %p1337_p13, %p993_p12 }
  0x22   : > { %p996_p3 = pneg %p995_p0 }
  0x24   : > { %p1001_p7 = pnand %p999_p5, %p996_p3 }
  0x26   : > { %1004 = shalt.err (!%p1001_p7)
}
  0x27   : > { %s1005_s10 = scalar_lea.vmem %s1314_s11, 256  ;;  %p1013_p2 = scmp.lt.s32.totalorder %s1314_s11, %s1314_s11 }
  0x28   : > { %p1006_p9 = scmp.ne.s32.totalorder %s1314_s11, %s1005_s10  ;;  %p1014_p6 = scmp.lt.s32.totalorder %s1005_s10, %s1005_s10 }
  0x2a   : > { %p1008_p10 = pnand %p1006_p9, %p1337_p13  ;;  %p1015_p12 = por %p1014_p6, %p1013_p2 }
  0x2c   : > { %p1009_p1 = pneg %p1008_p10 }
  0x2e   : > { %p1016_p0 = pnand %p1015_p12, %p1009_p1 }
  0x30   : > { %1019 = shalt.err (!%p1016_p0)
}
  0x31   : > { %s1219_s13 = smov 64   ;;  %s1220_s15 = smov 4  }
  0x32   : > { %903 = dma.hbm_to_vmem [thread:$0]  (!%p1321_p11), %s1645_s2, 256, %s1314_s11, [#allocation6], %s1219_s13, %s1219_s13, %s1220_s15  }
  0x33   : > { %s1647_s3 = sld [smem:[#allocation20_spill]] }
  0x39   : > { %s1020_s21 = scalar_lea.hbm %s1647_s3, 256 }
  0x3a   : > { %p1021_p1 = scmp.ne.s32.totalorder %s1647_s3, %s1020_s21  ;;  %p1027_p10 = scmp.lt.u32.totalorder %s1020_s21, %s1647_s3 }
  0x3c   : > { %p1023_p2 = pnand %p1021_p1, %p1337_p13 }
  0x3e   : > { %p1024_p6 = pneg %p1023_p2 }
  0x40   : > { %p1029_p3 = pnand %p1027_p10, %p1024_p6 }
  0x42   : > { %1032 = shalt.err (!%p1029_p3)
}
  0x43   : > { %s1033_s11 = scalar_lea.vmem %s1325_s14, 256  ;;  %p1041_p12 = scmp.lt.s32.totalorder %s1325_s14, %s1325_s14 }
  0x44   : > { %p1034_p5 = scmp.ne.s32.totalorder %s1325_s14, %s1033_s11  ;;  %p1042_p0 = scmp.lt.s32.totalorder %s1033_s11, %s1033_s11 }
  0x46   : > { %p1036_p7 = pnand %p1034_p5, %p1337_p13  ;;  %p1043_p1 = por %p1042_p0, %p1041_p12 }
  0x48   : > { %p1037_p9 = pneg %p1036_p7 }
  0x4a   : > { %p1044_p2 = pnand %p1043_p1, %p1037_p9 }
  0x4c   : > { %1047 = shalt.err (!%p1044_p2)
}
  0x4d   : > { %906 = dma.hbm_to_vmem [thread:$0]  (!%p1321_p11), %s1647_s3, 256, %s1325_s14, [#allocation9], %s1219_s13, %s1219_s13, %s1220_s15  }
  0x4e   : > { %s1048_s20 = scalar_lea.hbm %s1629_s4, 256 }
  0x4f   : > { %p1049_p6 = scmp.ne.s32.totalorder %s1629_s4, %s1048_s20  ;;  %p1055_p5 = scmp.lt.u32.totalorder %s1048_s20, %s1629_s4 }
  0x51   : > { %p1051_p10 = pnand %p1049_p6, %p1337_p13 }
  0x53   : > { %p1052_p3 = pneg %p1051_p10 }
  0x55   : > { %p1057_p7 = pnand %p1055_p5, %p1052_p3 }
  0x57   : > { %1060 = shalt.err (!%p1057_p7)
}
  0x58   : > { %s1061_s11 = scalar_lea.vmem %s254_s16, 256  ;;  %p1069_p1 = scmp.lt.s32.totalorder %s254_s16, %s254_s16 }
  0x59   : > { %p1062_p9 = scmp.ne.s32.totalorder %s254_s16, %s1061_s11  ;;  %p1070_p2 = scmp.lt.s32.totalorder %s1061_s11, %s1061_s11 }
  0x5b   : > { %p1064_p12 = pnand %p1062_p9, %p1337_p13  ;;  %p1071_p4 = por %p1070_p2, %p1069_p1 }
  0x5d   : > { %p1065_p0 = pneg %p1064_p12 }
  0x5f   : > { %p1072_p8 = pnand %p1071_p4, %p1065_p0 }
  0x61   : > { %1075 = shalt.err (!%p1072_p8)
}
  0x62   : > { %909 = dma.hbm_to_vmem [thread:$0]  (!%p1321_p11), %s1629_s4, 256, %s254_s16, [#allocation9], %s1219_s13, %s1219_s13, %s1220_s15  }
  0x63   : > { %s1410_s12 = sadd.s32 1, %s1214_s27   ;;  %s34_s17 = sadd.s32 1, %s1210_s26 }
  0x64   : > { %s31_s22 = ssub.s32 %s1214_s27, %s1410_s12  ;;  %p41_p8 = scmp.ne.s32.totalorder %s1210_s26, %s1206_s25 }
  0x65   : > { %p32_p4 = scmp.eq.s32.totalorder %s31_s22, 0  ;;  %p42_p13 = scmp.eq.s32.totalorder %s1214_s27, 0 }
  0x66   : > { %p924_p6 = scmp.lt.s32.totalorder %s1214_s27, 2  ;;  %p1648_p3 = scmp.eq.s32.totalorder %s1291_s28, 1 }
  0x67   : > { %s1420_s18 = scalar_select %p32_p4, %s1210_s26, %s34_s17  }
  0x68   : > { %p43_p10 = por %p42_p13, %p41_p8  ;;  %p1424_p5 = por %p1648_p3, %p41_p8 }
  0x69   : > { %s273_s20 = sand.u32 1, %s1210_s26   ;;  %s835_s21 = sshll.u32 %s1214_s27, 8 }
  0x6a   : > { %s1430_s16 = sshll.u32 %s273_s20, 4  ;;  %s1650_s0 = sld [smem:[#allocation18_spill]] }
  0x6b   : > { %s277_s29 = scalar_lea.vmem [#allocation2], %s1430_s16  ;;  %p1440_p11 = pnand %p924_p6, %p43_p10 }
  0x6c   : > { %s284_s10 = sshll.u32 %s277_s29, 4  ;;  %s1446_s14 = scalar_lea.sflag [#allocation3], %s273_s20  ;;  %s1444_s10 = int_to_ptr.vmem [resolvable:$true] %s284_s10 }
  0x6d   : > { %p1078_p9 = pneg %p1440_p11 }
  0x70   : > { %s1437_s23 = scalar_lea.hbm %s1650_s0, %s835_s21  ;;  %s1081_s13 = scalar_lea.hbm %s1650_s0, 512 }
  0x71   : > { %s1076_s8 = scalar_lea.hbm %s1437_s23, 256  ;;  %p1082_p1 = scmp.lt.u32.totalorder %s1437_s23, %s1650_s0 }
  0x72   : > { %p1077_p7 = scmp.ne.s32.totalorder %s1437_s23, %s1076_s8  ;;  %p1083_p2 = scmp.lt.u32.totalorder %s1081_s13, %s1076_s8 }
  0x73   : > { %p1085_p8 = scmp.lt.u32.totalorder %s1076_s8, %s1437_s23 }
  0x74   : > { %p1079_p12 = pnand %p1078_p9, %p1077_p7  ;;  %p1084_p4 = por %p1083_p2, %p1082_p1 }
  0x76   : > { %p1080_p0 = pneg %p1079_p12  ;;  %p1086_p13 = por %p1085_p8, %p1084_p4 }
  0x78   : > { %p1087_p6 = pnand %p1086_p13, %p1080_p0 }
  0x7a   : > { %1090 = shalt.err (!%p1087_p6)
}
  0x7b   : > { %s1091_s20 = scalar_lea.vmem %s1444_s10, 256  ;;  %s1221_s22 = smov [#allocation2]  }
  0x7c   : > { %p1092_p10 = scmp.ne.s32.totalorder %s1444_s10, %s1091_s20  ;;  %s1096_s17 = sshll.u32 %s1221_s22, 4  ;;  %s1097_s17 = int_to_ptr.vmem [resolvable:$false] %s1096_s17 }
  0x7d   : > { %s1098_s15 = scalar_lea.vmem %s1097_s17, 512  ;;  %p1099_p12 = scmp.lt.s32.totalorder %s1444_s10, %s1097_s17 }
  0x7e   : > { %p1094_p3 = pnand %p1092_p10, %p1078_p9  ;;  %p1100_p1 = scmp.lt.s32.totalorder %s1098_s15, %s1091_s20 }
  0x80   : > { %p1095_p7 = pneg %p1094_p3  ;;  %p1101_p2 = por %p1100_p1, %p1099_p12 }
  0x82   : > { %p1102_p4 = pnand %p1101_p2, %p1095_p7 }
  0x84   : > { %1105 = shalt.err (!%p1102_p4)
}
  0x85   : > { %s1222_s8 = smov 128   ;;  %s1223_s13 = smov 8  }
  0x86   : > { %913 = dma.hbm_to_vmem [thread:$0]  (!%p1440_p11), %s1437_s23, 256, %s1444_s10, %s1446_s14, %s1222_s8, %s1222_s8, %s1223_s13  }
  0x87   : > { %s1482_s22 = scalar_lea.hbm %s1626_s1, %s835_s21  ;;  %s298_s17 = scalar_lea.vmem [#allocation5], %s1430_s16 }
  0x88   : > { %s305_s15 = sshll.u32 %s298_s17, 4  ;;  %s294_s0 = sand.u32 1, %s1214_s27   ;;  %s1486_s15 = int_to_ptr.vmem [resolvable:$true] %s305_s15 }
  0x89   : > { %s1488_s2 = scalar_lea.sflag [#allocation6], %s294_s0  ;;  %s1106_s3 = scalar_lea.hbm %s1482_s22, 256 }
  0x8a   : > { %p1107_p0 = scmp.ne.s32.totalorder %s1482_s22, %s1106_s3  ;;  %s1111_s10 = scalar_lea.hbm %s1626_s1, 512 }
  0x8b   : > { %p1112_p6 = scmp.lt.u32.totalorder %s1482_s22, %s1626_s1  ;;  %p1113_p10 = scmp.lt.u32.totalorder %s1111_s10, %s1106_s3 }
  0x8c   : > { %p1109_p8 = pnand %p1107_p0, %p1078_p9  ;;  %p1115_p7 = scmp.lt.u32.totalorder %s1106_s3, %s1482_s22 }
  0x8d   : > { %p1114_p3 = por %p1113_p10, %p1112_p6 }
  0x8e   : > { %p1110_p13 = pneg %p1109_p8 }
  0x8f   : > { %p1116_p12 = por %p1115_p7, %p1114_p3 }
  0x91   : > { %p1117_p1 = pnand %p1116_p12, %p1110_p13 }
  0x93   : > { %1120 = shalt.err (!%p1117_p1)
}
  0x94   : > { %s1121_s0 = scalar_lea.vmem %s1486_s15, 256  ;;  %s1224_s16 = smov [#allocation5]  }
  0x95   : > { %p1122_p2 = scmp.ne.s32.totalorder %s1486_s15, %s1121_s0  ;;  %s1126_s20 = sshll.u32 %s1224_s16, 4  ;;  %s1127_s20 = int_to_ptr.vmem [resolvable:$false] %s1126_s20 }
  0x96   : > { %s1128_s17 = scalar_lea.vmem %s1127_s20, 512  ;;  %p1129_p8 = scmp.lt.s32.totalorder %s1486_s15, %s1127_s20 }
  0x97   : > { %p1124_p4 = pnand %p1122_p2, %p1078_p9  ;;  %p1130_p6 = scmp.lt.s32.totalorder %s1128_s17, %s1121_s0 }
  0x99   : > { %p1125_p0 = pneg %p1124_p4  ;;  %p1131_p10 = por %p1130_p6, %p1129_p8 }
  0x9b   : > { %p1132_p3 = pnand %p1131_p10, %p1125_p0 }
  0x9d   : > { %1135 = shalt.err (!%p1132_p3)
}
  0x9e   : > { %916 = dma.hbm_to_vmem [thread:$0]  (!%p1440_p11), %s1482_s22, 256, %s1486_s15, %s1488_s2, %s1222_s8, %s1222_s8, %s1223_s13  }
  0x9f   : > { %p1652_p9 = scmp.ne.s32.totalorder %s1643_s9, 0 }
  0xa0   : > { %s1520_s3 = sand.u32 (!%p1652_p9), 1, %s1206_s25   ;;  %p1653_p13 = scmp.ne.s32.totalorder (!%p1652_p9), %s1640_s30, 0 }
  0xa1   : > { %317 = sbr.rel (%p1652_p9) target bundleno = 891 (0x37b), region = 48  ;;  %s1523_s23 = sshll.u32 (!%p1652_p9), %s1520_s3, 4 }
  0xa2   : > { %s320_s11 = scalar_lea.sflag (!%p1652_p9), [#allocation3], %s1520_s3  ;;  %s323_s21 = scalar_lea.vmem (!%p1652_p9), [#allocation2], %s1523_s23 }
  0xa8   : > { %1181 = dma.done.wait (%p1653_p13), %s320_s11, 256  }
  0xa9   : > { %1183 = vsyncadd (%p1653_p13), %s320_s11, 4294967040  ;;  %s328_s2 = sand.u32 1, %s1291_s28   ;;  %s332_s8 = scalar_lea.vmem [#allocation5], %s1523_s23 }
  0xaa   : > { %s329_s9 = scalar_lea.sflag [#allocation6], %s328_s2 }
  0xab   : > { %1185 = dma.done.wait (%p1653_p13), %s329_s9, 256  }
  0xac   : > { %1187 = vsyncadd (%p1653_p13), %s329_s9, 4294967040  ;;  %p1654_p11 = scmp.eq.s32.totalorder %s1291_s28, 0 }
  0xae   : > { %1189 = dma.done.wait (%p1654_p11), [#allocation6], 256   ;;  %p1655_p7 = pmov %p1654_p11 }
  0xb0   : > { %1191 = vsyncadd (%p1655_p7), [#allocation6], 4294967040  ;;  %p1656_p12 = pmov %p1655_p7 }
  0xb1   : > { %p1657_p1 = pmov %p1655_p7 }
  0xb2   : > { %1193 = dma.done.wait (%p1656_p12), [#allocation9], 512  }
  0xb3   : > { %1195 = vsyncadd (%p1657_p1), [#allocation9], 4294966784  ;;  %v1225_v0 = vmov 0.0   ;;  %vm1226_vm0 = vmmov 0   ;;  %v972_v1 = vld [vmem:[#allocation8] sm:$0xff]   ;;  %v973_v2 = vld [vmem:[#allocation7] sm:$0xff]  }
  0xb4   : > { %850 = vmatprep.subr.bf16.mxu0 %v1225_v0  ;;  %858 = vmatprep.subr.bf16.mxu1 %v1225_v0  ;;  %v974_v3 = vld [vmem:[#allocation8 + $0x8] sm:$0xff]   ;;  %v975_v4 = vld [vmem:[#allocation7 + $0x8] sm:$0xff]   ;;  %v387_v5 = vld [vmem:[%s332_s8] sm:$0xff]  ;;  %vm410_vm1 = vcmask 261120   ;;  %s837_s17 = sshll.u32 %s1291_s28, 8  ;;  %s379_s11 = scalar_lea.vmem [#allocation11], %s1523_s23 }
  0xb5   : > { %854 = vmatprep.mubr.msk.bf16.mxu0 %vm1226_vm0, %v1225_v0  ;;  %862 = vmatprep.mubr.msk.bf16.mxu1 %vm1226_vm0, %v1225_v0  ;;  %v388_v6 = vld [vmem:[%s332_s8 + $0x8] sm:$0xff]  ;;  %v384_v7 = vld [vmem:[%s323_s21] sm:$0xff]  ;;  %s1577_s8 = scalar_lea.hbm %s1632_s7, %s837_s17  ;;  %s659_s30 = scalar_lea.sflag [#allocation4], %s1520_s3 }
  0xb6   : > { %851 = vmatpush3.bf16.msra.mxu0 %v972_v1  ;;  %859 = vmatpush3.bf16.msra.mxu1 %v973_v2  ;;  %v389_v8 = vpack.c.bf16 %v388_v6, %v387_v5  ;;  %v385_v9 = vld [vmem:[%s323_s21 + $0x8] sm:$0xff]  ;;  %v976_v11 = vld [vmem:[#allocation10] sm:$0xff]   ;;  %s672_s21 = sshll.u32 %s379_s11, 4  ;;  %s1227_s23 = smov [#allocation11]   ;;  %s1579_s21 = int_to_ptr.vmem [resolvable:$true] %s672_s21 }
  0xb7   : > { %852 = vmatprep.subr.bf16.mxu0 %v1225_v0  ;;  %860 = vmatprep.subr.bf16.mxu1 %v1225_v0  ;;  %v386_v10 = vpack.c.bf16 %v385_v9, %v384_v7  ;;  %v977_v12 = vld [vmem:[#allocation10 + $0x8] sm:$0xff]   ;;  %v821_v15 = vld [vmem:[%s1631_s6] ss:$0 sm:$0xff]  ;;  %v822_v31 = vld [vmem:[%s1631_s6 + $0x1] ss:$0 sm:$0xff]  ;;  %s1136_s28 = scalar_lea.vmem %s1579_s21, 256 }
  0xb8   : > { %v978_v29 = vld [vmem:[%s1630_s5] sm:$0xff]   ;;  %v979_v30 = vld [vmem:[%s1630_s5 + $0x8] sm:$0xff]   ;;  %p1137_p2 = scmp.ne.s32.totalorder %s1579_s21, %s1136_s28  ;;  %s1140_s13 = sshll.u32 %s1227_s23, 4  ;;  %s1141_s13 = int_to_ptr.vmem [resolvable:$false] %s1140_s13 }
  0xb9   : > { %v826_v41 = vld [vmem:[%s1631_s6 + $0x2] ss:$0 sm:$0xff]  ;;  %s1142_s22 = scalar_lea.vmem %s1141_s13, 512  ;;  %p1143_p8 = scmp.lt.s32.totalorder %s1579_s21, %s1141_s13 }
  0xba   : > { %853 = vmatpush3.bf16.msra.mxu0 %v974_v3  ;;  %861 = vmatpush3.bf16.msra.mxu1 %v975_v4  ;;  %p1138_p4 = pnand %p1137_p2, %p1424_p5  ;;  %p1144_p6 = scmp.lt.s32.totalorder %s1142_s22, %s1136_s28 }
  0xbb   : > { %866 = vmatprep.subr.bf16.mxu0 %v1225_v0  ;;  %874 = vmatprep.subr.bf16.mxu1 %v1225_v0 }
  0xbc   : > { %p1139_p0 = pneg %p1138_p4  ;;  %p1145_p10 = por %p1144_p6, %p1143_p8 }
  0xbd   : > { %855 = vmatmul.mubr.msk.bf16.vlgmr.msra.gmra.mrb[0].mxu0 %vm410_vm1, %v389_v8  ;;  %863 = vmatmul.mubr.msk.bf16.vlgmr.msra.gmra.mrb[0].mxu1 %vm410_vm1, %v386_v10 }
  0xbe   : > { %870 = vmatprep.mubr.msk.bf16.mxu0 %vm1226_vm0, %v1225_v0  ;;  %878 = vmatprep.mubr.msk.bf16.mxu1 %vm1226_vm0, %v1225_v0  ;;  %p1146_p3 = pnand %p1145_p10, %p1139_p0 }
  0xbf   : > { %867 = vmatpush3.bf16.msra.mxu0 %v976_v11  ;;  %875 = vmatpush3.bf16.msra.mxu1 %v978_v29 }
  0xc0   : > { %868 = vmatprep.subr.bf16.mxu0 %v1225_v0  ;;  %876 = vmatprep.subr.bf16.mxu1 %v1225_v0 }
  0xc3   : > { %869 = vmatpush3.bf16.msra.mxu0 %v977_v12  ;;  %877 = vmatpush3.bf16.msra.mxu1 %v979_v30 }
 0x190   : > { %v448_v13 = vpop.f32.mrb[0].mxu0  ;;  %v504_v14 = vpop.f32.mrb[0].mxu1 }
 0x191   : > { %v856_v16 = vpop.f32.mrb[1].mxu0  ;;  %v505_v17 = vadd.f32 %v504_v14, %v448_v13  ;;  %v864_v18 = vpop.f32.mrb[1].mxu1 }
 0x192   : > { %v451_v19 = vpop.f32.mrb[2].mxu0  ;;  %v507_v20 = vpop.f32.mrb[2].mxu1 }
 0x193   : > { %v857_v21 = vpop.f32.mrb[3].mxu0  ;;  %v516_v22 = vadd.f32 %v821_v15, %v505_v17  ;;  %v508_v23 = vadd.f32 %v507_v20, %v451_v19  ;;  %v865_v24 = vpop.f32.mrb[3].mxu1 }
 0x195   : > { %v517_v25 = vadd.f32 %v821_v15, %v508_v23  ;;  %980 = vtanh.f32 %v516_v22 }
 0x197   : > { %982 = vtanh.f32 %v517_v25 }
 0x19f   : > { %v981_v26 = vpop.eup %980 }
 0x1a1   : > { %v983_v27 = vpop.eup %982 }
 0x1a2   : > { %v520_v28 = vpack.c.bf16 %v983_v27, %v981_v26 }
 0x1a4   : > { %871 = vmatmul.mubr.msk.bf16.vlgmr.msra.gmra.mrb[4].mxu0 %vm410_vm1, %v520_v28 }
 0x277   : > { %v579_v32 = vpop.f32.mrb[4].mxu0 }
 0x278   : > { %v580_v33 = vadd.f32 %v822_v31, %v579_v32  ;;  %v872_v34 = vpop.f32.mrb[5].mxu0 }
 0x279   : > { %v582_v35 = vpop.f32.mrb[6].mxu0 }
 0x27a   : > { %v583_v36 = vadd.f32 %v822_v31, %v582_v35  ;;  %v873_v37 = vpop.f32.mrb[7].mxu0  ;;  %984 = vtanh.f32 %v580_v33 }
 0x27c   : > { %986 = vtanh.f32 %v583_v36 }
 0x284   : > { %v985_v38 = vpop.eup %984 }
 0x286   : > { %v987_v39 = vpop.eup %986 }
 0x287   : > { %v588_v40 = vpack.c.bf16 %v987_v39, %v985_v38 }
 0x289   : > { %879 = vmatmul.mubr.msk.bf16.vlgmr.msra.gmra.mrb[4].mxu1 %vm410_vm1, %v588_v40 }
 0x35c   : > { %v647_v42 = vpop.f32.mrb[4].mxu1 }
 0x35d   : > { %v648_v43 = vadd.f32 %v826_v41, %v647_v42  ;;  %v880_v44 = vpop.f32.mrb[5].mxu1 }
 0x35e   : > { %v650_v45 = vpop.f32.mrb[6].mxu1 }
 0x35f   : > { %988 = vtanh.f32 %v648_v43  ;;  %v651_v46 = vadd.f32 %v826_v41, %v650_v45  ;;  %v881_v47 = vpop.f32.mrb[7].mxu1 }
 0x361   : > { %990 = vtanh.f32 %v651_v46 }
 0x369   : > { %v989_v48 = vpop.eup %988 }
 0x36a   : > { %656 = vst.msk [vmem:[%s379_s11] sm:$0xff] %vm410_vm1, %v989_v48 }
 0x36b   : > { %v991_v49 = vpop.eup %990 }
 0x36c   : > { %657 = vst.msk [vmem:[%s379_s11 + $0x8] sm:$0xff] %vm410_vm1, %v991_v49 }
 0x36d   : > { %1149 = shalt.err (!%p1146_p3)
}
 0x36e   : > { %s1150_s15 = scalar_lea.hbm %s1577_s8, 256  ;;  %s1154_s29 = scalar_lea.hbm %s1632_s7, 512 }
 0x36f   : > { %p1151_p9 = scmp.ne.s32.totalorder %s1577_s8, %s1150_s15  ;;  %p1155_p7 = scmp.lt.u32.totalorder %s1577_s8, %s1632_s7 }
 0x370   : > { %p1156_p12 = scmp.lt.u32.totalorder %s1154_s29, %s1150_s15  ;;  %p1158_p2 = scmp.lt.u32.totalorder %s1150_s15, %s1577_s8 }
 0x371   : > { %p1152_p13 = pnand %p1151_p9, %p1424_p5 }
 0x372   : > { %p1157_p1 = por %p1156_p12, %p1155_p7 }
 0x373   : > { %p1153_p11 = pneg %p1152_p13 }
 0x374   : > { %p1159_p4 = por %p1158_p2, %p1157_p1 }
 0x376   : > { %p1160_p0 = pnand %p1159_p4, %p1153_p11 }
 0x378   : > { %1163 = shalt.err (!%p1160_p0)
}
 0x379   : > { %s1228_s20 = smov 128   ;;  %s1229_s17 = smov 8  }
 0x37a   : > { %898 = dma.vmem_to_hbm [thread:$0]  (%p1424_p5), %s1579_s21, 256, %s1577_s8, %s659_s30, %s1228_s20, %s1228_s20, %s1229_s17  }
 0x37b PF: > { %s1658_s11 = sld [smem:[#allocation17_spill]]  ;;  %s687_s2 = sand.u32 1, %s1202_s24  }
 0x37c   : > { %p1660_p6 = scmp.ge.s32.totalorder %s1214_s27, 2  ;;  %s688_s9 = scalar_lea.sflag [#allocation4], %s687_s2 }
 0x381   : > { %p1659_p8 = scmp.ne.s32.totalorder %s1658_s11, 0 }
 0x383   : > { %p918_p10 = pnand %p1660_p6, %p1659_p8 }
 0x385   : > { %1197 = dma.done.wait (!%p918_p10), %s688_s9, 256  }
 0x386   : > { %1199 = vsyncadd (!%p918_p10), %s688_s9, 4294967040  ;;  %p24_p3 = scmp.ge.s32.totalorder %s1410_s12, 4   ;;  %s1661_s24 = smov %s1206_s25 }
 0x387   : > { %s1662_s25 = smov %s1210_s26  ;;  %s1663_s26 = smov %s1420_s18 }
 0x388   : > { %s1664_s27 = smov %s1410_s12  ;;  %26 = sbr.rel (!%p24_p3) target bundleno = 12 (0xc), region = 118 }
 0x38f   :  { %693 = vsyncpa [#allocation3], 1 }
 0x390   :  { %695 = vsyncpa [#allocation3 + $0x1], 1 }
 0x391   :  { %696 = vsyncpa [#allocation6], 1 }
 0x392   :  { %698 = vsyncpa [#allocation6 + $0x1], 1 }
 0x393   :  { %699 = vsyncpa [#allocation9], 1 }
 0x394   :  { %700 = vsyncpa [#allocation4], 1 }
 0x395   :  { %702 = vsyncpa [#allocation4 + $0x1], 1 }

</bundles_post_ra>
